<compile_context>
chip_gen: v6e
topology: v6e:2x2x1
jax: 0.10.0
libtpu: 0.0.40
codegen_flags: <defaults>
</compile_context>

<pallas_src>
import functools

import jax
import jax.numpy as jnp
from jax import lax
from jax.experimental import pallas as pl
from jax.experimental.pallas import tpu as pltpu


def _mse_partial_kernel(x_ref, t_ref, o_ref, *, block_rows, blocks_per_core,
                        valid_rows, mask_rows):
    """Accumulate per-lane partial sums of (x - t)^2 into o_ref of shape (1, cols)."""
    i = pl.program_id(1)  # "arbitrary" reduction axis (carries the accumulator)

    @pl.when(i == 0)
    def _():
        o_ref[...] = jnp.zeros_like(o_ref)

    d = x_ref[...].astype(jnp.float32) - t_ref[...].astype(jnp.float32)
    sq = d * d

    if mask_rows:
        # Zero out rows beyond the logical extent (partial last block and/or
        # clamped duplicate blocks contribute exactly 0).
        c = pl.program_id(0)
        row0 = (c * blocks_per_core + i) * block_rows
        row = row0 + lax.broadcasted_iota(jnp.int32, sq.shape, 0)
        sq = jnp.where(row < valid_rows, sq, 0.0)

    # Sublane reduce each step keeps the resident accumulator tiny (1, cols)
    # and rides otherwise-idle VPU/XLU slots (kernel is HBM-bound).
    o_ref[...] += jnp.sum(sq, axis=0, keepdims=True)


def mse_loss(input_, target, *, max_block_rows=1024, block_cols=512):
    """Mean squared error: mean((input_ - target)**2). Returns scalar float32."""
    assert input_.shape == target.shape, "input_ and target must have the same shape"

    n_true = 1
    for s in input_.shape:
        n_true *= s
    assert n_true > 0, "empty input"

    x = jnp.reshape(input_, (-1,))
    t = jnp.reshape(target, (-1,))

    # Largest prefix that reshapes (for free, in the aligned case) to (rows, 512).
    n_main = (n_true // block_cols) * block_cols
    n_tail = n_true - n_main

    total = jnp.float32(0.0)

    if n_main > 0:
        x_main = x if n_main == n_true else x[:n_main]
        t_main = t if n_main == n_true else t[:n_main]
        rows = n_main // block_cols
        x2d = x_main.reshape(rows, block_cols)
        t2d = t_main.reshape(rows, block_cols)

        # Tile rows: full extent for small inputs (valid BlockSpec: equals the
        # array dim), otherwise 1024 rows (multiple of 8/16) -> ~2 MiB f32 tiles.
        block_rows = rows if rows <= max_block_rows else max_block_rows
        num_blocks = pl.cdiv(rows, block_rows)

        # Parallel split across (up to) 2 TensorCores; no-op on 1-TC chips.
        n_par = 2 if num_blocks >= 2 else 1
        blocks_per_core = pl.cdiv(num_blocks, n_par)
        mask_rows = (n_par * blocks_per_core * block_rows) != rows

        if n_par * blocks_per_core == num_blocks:
            def in_map(c, i):
                return (c * blocks_per_core + i, 0)
        else:
            # Clamp so no DMA ever targets a fully out-of-bounds block; the
            # duplicated block's contribution is masked to 0 in-kernel.
            def in_map(c, i):
                return (jnp.minimum(c * blocks_per_core + i, num_blocks - 1), 0)

        kernel = functools.partial(
            _mse_partial_kernel,
            block_rows=block_rows,
            blocks_per_core=blocks_per_core,
            valid_rows=rows,
            mask_rows=mask_rows,
        )

        partials = pl.pallas_call(
            kernel,
            out_shape=jax.ShapeDtypeStruct((n_par, block_cols), jnp.float32),
            grid=(n_par, blocks_per_core),
            in_specs=[
                pl.BlockSpec((block_rows, block_cols), in_map),
                pl.BlockSpec((block_rows, block_cols), in_map),
            ],
            # Lane-dense per-core partial-sum vector; same block across the
            # "arbitrary" axis -> resident accumulator.
            out_specs=pl.BlockSpec((1, block_cols), lambda c, i: (c, 0)),
            compiler_params=pltpu.CompilerParams(
                dimension_semantics=("parallel", "arbitrary"),
            ),
            cost_estimate=pl.CostEstimate(
                flops=3 * n_main,
                transcendentals=0,
                bytes_accessed=2 * n_main * x.dtype.itemsize + n_par * block_cols * 4,
            ),
        )(x2d, t2d)

        total = total + jnp.sum(partials)

    if n_tail > 0:
        # Tiny (< 512 elements) unaligned tail handled with plain jnp.
        dt = x[n_main:].astype(jnp.float32) - t[n_main:].astype(jnp.float32)
        total = total + jnp.sum(dt * dt)

    return total * jnp.float32(1.0 / n_true)


def _reference(input_, target):
    d = input_.astype(jnp.float32) - target.astype(jnp.float32)
    return jnp.mean(d * d)


if __name__ == "__main__":
    key = jax.random.PRNGKey(0)
    k_x, k_t = jax.random.split(key)

    # Small shape consistent with a generic prediction/target pair.
    shape = (2, 4, 16, 16)
    x = jax.random.normal(k_x, shape, dtype=jnp.float32)
    target = jax.random.normal(k_t, shape, dtype=jnp.float32)

    loss = mse_loss(x, target)
    jax.block_until_ready(loss)
    expected = _reference(x, target)
    assert jnp.allclose(loss, expected, rtol=1e-6, atol=1e-6), (loss, expected)

    # Extra validation: multi-block + 2-way parallel split + row mask + jnp tail.
    k_x2, k_t2 = jax.random.split(k_x)
    shape2 = (1200, 1030)  # 1,236,000 elements: rows=2414 (+ tail of 32)
    x2 = jax.random.normal(k_x2, shape2, dtype=jnp.float32)
    t2 = jax.random.normal(k_t2, shape2, dtype=jnp.float32)
    loss2 = mse_loss(x2, t2)
    jax.block_until_ready(loss2)
    expected2 = _reference(x2, t2)
    assert jnp.allclose(loss2, expected2, rtol=1e-5, atol=1e-5), (loss2, expected2)

    print("KERNEL_OK")
</pallas_src>

<mosaic_0001>
module attributes {stable_mosaic.version = 11 : i64} {
  func.func @_mse_partial_kernel(%arg0: i32, %arg1: i32, %arg2: memref<4x512xf32, #tpu.memory_space<vmem>>, %arg3: memref<4x512xf32, #tpu.memory_space<vmem>>, %arg4: memref<1x512xf32, #tpu.memory_space<vmem>>) attributes {dimension_semantics = [#tpu.dimension_semantics<parallel>, #tpu.dimension_semantics<arbitrary>], iteration_bounds = array<i64: 1, 1>, scalar_prefetch = 0 : i64, scratch_operands = 0 : i64, tpu.core_type = #tpu.core_type<tc>, window_params = [{transform_indices = @transform_0, window_bounds = array<i64: 4, 512>}, {transform_indices = @transform_1, window_bounds = array<i64: 4, 512>}, {transform_indices = @transform_2, window_bounds = array<i64: 1, 512>}]} {
    %c0_i32 = arith.constant 0 : i32
    %0 = arith.cmpi eq, %arg1, %c0_i32 : i32
    %1 = arith.extui %0 : i1 to i32
    %c0_i32_0 = arith.constant 0 : i32
    %2 = arith.cmpi ne, %1, %c0_i32_0 : i32
    scf.if %2 {
      %cst_8 = arith.constant 0.000000e+00 : f32
      %12 = vector.broadcast %cst_8 : f32 to vector<1x512xf32>
      %c0_9 = arith.constant 0 : index
      %c0_10 = arith.constant 0 : index
      %13 = vector.load %arg4[%c0_9, %c0_10] : memref<1x512xf32, #tpu.memory_space<vmem>>, vector<1x512xf32>
      tpu.vector_store %arg4[%c0_9, %c0_10], %12 {strides = array<i32>} : memref<1x512xf32, #tpu.memory_space<vmem>>, vector<1x512xf32>,
    } else {
    }
    %c0 = arith.constant 0 : index
    %c0_1 = arith.constant 0 : index
    %3 = vector.load %arg2[%c0, %c0_1] : memref<4x512xf32, #tpu.memory_space<vmem>>, vector<4x512xf32>
    %c0_2 = arith.constant 0 : index
    %c0_3 = arith.constant 0 : index
    %4 = vector.load %arg3[%c0_2, %c0_3] : memref<4x512xf32, #tpu.memory_space<vmem>>, vector<4x512xf32>
    %5 = arith.subf %3, %4 : vector<4x512xf32>
    %6 = arith.mulf %5, %5 : vector<4x512xf32>
    %c0_4 = arith.constant 0 : index
    %c0_5 = arith.constant 0 : index
    %7 = vector.load %arg4[%c0_4, %c0_5] : memref<1x512xf32, #tpu.memory_space<vmem>>, vector<1x512xf32>
    %cst = arith.constant dense<0.000000e+00> : vector<512xf32>
    %8 = vector.multi_reduction <add>, %6, %cst [0] : vector<4x512xf32> to vector<512xf32>
    %9 = vector.shape_cast %8 : vector<512xf32> to vector<1x512xf32>
    %10 = arith.addf %7, %9 : vector<1x512xf32>
    %c0_6 = arith.constant 0 : index
    %c0_7 = arith.constant 0 : index
    %11 = vector.load %arg4[%c0_6, %c0_7] : memref<1x512xf32, #tpu.memory_space<vmem>>, vector<1x512xf32>
    tpu.vector_store %arg4[%c0_6, %c0_7], %10 {strides = array<i32>} : memref<1x512xf32, #tpu.memory_space<vmem>>, vector<1x512xf32>,
    return
  }
  func.func @transform_0(%arg0: i32, %arg1: i32) -> (i32, i32) {
    %c1_i32 = arith.constant 1 : i32
    %0 = arith.muli %arg0, %c1_i32 : i32
    %1 = arith.addi %0, %arg1 : i32
    %c0_i32 = arith.constant 0 : i32
    %c0_i32_0 = arith.constant 0 : i32
    return %1, %c0_i32 : i32, i32
  }
  func.func @transform_1(%arg0: i32, %arg1: i32) -> (i32, i32) {
    %c1_i32 = arith.constant 1 : i32
    %0 = arith.muli %arg0, %c1_i32 : i32
    %1 = arith.addi %0, %arg1 : i32
    %c0_i32 = arith.constant 0 : i32
    %c0_i32_0 = arith.constant 0 : i32
    return %1, %c0_i32 : i32, i32
  }
  func.func @transform_2(%arg0: i32, %arg1: i32) -> (i32, i32) {
    %c0_i32 = arith.constant 0 : i32
    %c0_i32_0 = arith.constant 0 : i32
    return %arg0, %c0_i32 : i32, i32
  }
}

</mosaic_0001>

<bundles_post_ra>
// kernel: tpu_custom_call.1
= control target key start
LH: loop header
LB: loop body
LE: loop exit
PB: predicated region body
PF: predicated region fallthrough
CT: control target
= control target key end

     0   :  { %7 = vsyncpa [#allocation3], 0  ;;  %s258_s0 = inlined_call_operand.hbm [shape: f32[4,512], index: 0, kind: input, shape index: {}]   ;;  %s259_s1 = inlined_call_operand.hbm [shape: f32[4,512], index: 1, kind: input, shape index: {}]   ;;  %s260_s2 = inlined_call_operand.hbm [shape: f32[1,512], index: 2, kind: output, shape index: {}]  }
   0x1   :  { %8 = vsyncpa [#allocation6], 0 }
   0x2   :  { %9 = vsyncpa [#allocation4], 0  ;;  %s221_s9 = smov [#allocation2]   ;;  %s222_s11 = smov [#allocation5]  }
   0x3   :  { %s20_s10 = sshll.u32 %s221_s9, 4  ;;  %s34_s12 = sshll.u32 %s222_s11, 4  ;;  %s21_s10 = int_to_ptr.vmem [resolvable:$true] %s20_s10  ;;  %s35_s12 = int_to_ptr.vmem [resolvable:$true] %s34_s12 }
   0x4   :  { %s163_s13 = scalar_lea.vmem %s21_s10, 256  ;;  %p168_p1 = scmp.lt.s32.totalorder %s21_s10, %s21_s10 }
   0x5   :  { %p164_p0 = scmp.ne.s32.totalorder %s21_s10, %s163_s13  ;;  %p169_p2 = scmp.lt.s32.totalorder %s163_s13, %s163_s13 }
   0x7   :  { %p170_p3 = por %p169_p2, %p168_p1 }
   0x9   :  { %p171_p4 = pnand %p170_p3, %p164_p0 }
   0xb   :  { %174 = shalt.err (!%p171_p4)
}
   0xc   :  { %23 = dma.hbm_to_vmem [thread:$0]  %s258_s0, 256, %s21_s10, [#allocation3]  }
   0xd   :  { %s183_s16 = scalar_lea.vmem %s35_s12, 256  ;;  %p188_p6 = scmp.lt.s32.totalorder %s35_s12, %s35_s12 }
   0xe   :  { %p184_p5 = scmp.ne.s32.totalorder %s35_s12, %s183_s16  ;;  %p189_p7 = scmp.lt.s32.totalorder %s183_s16, %s183_s16 }
  0x10   :  { %p190_p8 = por %p189_p7, %p188_p6 }
  0x12   :  { %p191_p9 = pnand %p190_p8, %p184_p5 }
  0x14   :  { %194 = shalt.err (!%p191_p9)
}
  0x15   :  { %37 = dma.hbm_to_vmem [thread:$0]  %s259_s1, 256, %s35_s12, [#allocation6]  }
  0x16   :  { %215 = dma.done.wait [#allocation3], 256  }
  0x17   :  { %216 = vsyncadd [#allocation3], 4294967040 }
  0x18   :  { %217 = dma.done.wait [#allocation6], 256  }
  0x19   :  { %218 = vsyncadd [#allocation6], 4294967040  ;;  %v50_v0 = vlaneseq  ;;  %v223_v2 = vmov 0.0   ;;  %v55_v3 = vld [vmem:[#allocation2] sm:$0xff]  ;;  %v56_v4 = vld [vmem:[#allocation2 + $0x8] sm:$0xff]  ;;  %vm70_vm1 = vcmask 1043456  }
  0x1a   :  { %v57_v5 = vld [vmem:[#allocation5] sm:$0xff]  ;;  %v58_v6 = vld [vmem:[#allocation5 + $0x8] sm:$0xff]  ;;  %v224_v25 = vmov 1966171168   ;;  %s225_s0 = smov [#allocation7]  }
  0x1b   :  { %vm247_vm0 = vcmp.lt.s32.totalorder %v50_v0, 512  ;;  %v59_v7 = vsub.f32 %v55_v3, %v57_v5  ;;  %v60_v8 = vsub.f32 %v56_v4, %v58_v6  ;;  %v106_v26 = vunpack.c.l.s4 %v224_v25  ;;  %s140_s1 = sshll.u32 %s225_s0, 4  ;;  %s141_s1 = int_to_ptr.vmem [resolvable:$true] %s140_s1 }
  0x1c   :  { %54 = vst.msk [vmem:[#allocation7] sm:$0xf] %vm247_vm0, %v223_v2  ;;  %v109_v36 = vshrl.u32 %v50_v0, 7  ;;  %s195_s19 = scalar_lea.vmem %s141_s1, 64  ;;  %p200_p11 = scmp.lt.s32.totalorder %s141_s1, %s141_s1 }
  0x1d   :  { %v61_v9 = vmul.f32 %v59_v7, %v59_v7  ;;  %v62_v10 = vmul.f32 %v60_v8, %v60_v8  ;;  %v107_v35 = vunpack.c.0.s8 %v106_v26  ;;  %p196_p10 = scmp.ne.s32.totalorder %s141_s1, %s195_s19  ;;  %p201_p12 = scmp.lt.s32.totalorder %s195_s19, %s195_s19 }
  0x1f   :  { %v66_v11 = vcombine.high %v61_v9, %v61_v9  ;;  %v71_v12 = vsel %vm70_vm1, %v61_v9, 0.0  ;;  %v67_v13 = vcombine.high %v62_v10, %v62_v10  ;;  %v85_v15 = vsel %vm70_vm1, %v62_v10, 0.0  ;;  %p202_p13 = por %p201_p12, %p200_p11 }
  0x20   :  { %v72_v14 = vrot.slane %v71_v12, 4  ;;  %v86_v17 = vrot.slane %v85_v15, 4  ;;  %v110_v44 = vsub.s32 %v107_v35, %v109_v36 }
  0x21   :  { %v78_v16 = vsel %vm70_vm1, %v66_v11, 0.0  ;;  %v92_v20 = vsel %vm70_vm1, %v67_v13, 0.0  ;;  %p203_p0 = pnand %p202_p13, %p196_p10 }
  0x22   :  { %v73_v18 = vadd.f32 %v72_v14, %v71_v12  ;;  %v79_v19 = vrot.slane %v78_v16, 4  ;;  %v87_v21 = vadd.f32 %v86_v17, %v85_v15  ;;  %v93_v22 = vrot.slane %v92_v20, 4 }
  0x23   :  { %v63_v51 = vld [vmem:[#allocation7] sm:$0xf] }
  0x24   :  { %v74_v23 = vrot.slane %v73_v18, 2  ;;  %v80_v24 = vadd.f32 %v79_v19, %v78_v16  ;;  %v88_v27 = vrot.slane %v87_v21, 2  ;;  %v94_v28 = vadd.f32 %v93_v22, %v92_v20 }
  0x26   :  { %v75_v29 = vadd.f32 %v74_v23, %v73_v18  ;;  %v81_v30 = vrot.slane %v80_v24, 2  ;;  %v89_v31 = vadd.f32 %v88_v27, %v87_v21  ;;  %v95_v32 = vrot.slane %v94_v28, 2 }
  0x28   :  { %v76_v33 = vrot.slane %v75_v29, 1  ;;  %v82_v34 = vadd.f32 %v81_v30, %v80_v24  ;;  %v90_v37 = vrot.slane %v89_v31, 1  ;;  %v96_v38 = vadd.f32 %v95_v32, %v94_v28 }
  0x2a   :  { %v77_v39 = vadd.f32 %v76_v33, %v75_v29  ;;  %v83_v40 = vrot.slane %v82_v34, 1  ;;  %v91_v41 = vadd.f32 %v90_v37, %v89_v31  ;;  %v97_v42 = vrot.slane %v96_v38, 1 }
  0x2c   :  { %v84_v43 = vadd.f32 %v83_v40, %v82_v34  ;;  %v98_v45 = vadd.f32 %v97_v42, %v96_v38 }
  0x2e   :  { %v103_v46 = vcombine.low %v77_v39, %v84_v43  ;;  %v104_v47 = vcombine.low %v91_v41, %v98_v45 }
  0x30   :  { %v111_v48 = vrot.slane %v103_v46, %v110_v44  ;;  %v118_v49 = vrot.slane %v104_v47, %v110_v44 }
  0x32   :  { %v119_v50 = vcombine.low %v111_v48, %v118_v49 }
  0x34   :  { %v126_v52 = vrot.slane %v119_v50, %v110_v44 }
  0x36   :  { %v128_v53 = vadd.f32 %v126_v52, %v63_v51 }
  0x38   :  { %133 = vst.msk [vmem:[#allocation7] sm:$0xf] %vm247_vm0, %v128_v53 }
  0x39   :  { %206 = shalt.err (!%p203_p0)
}
  0x3a   :  { %143 = dma.vmem_to_hbm [thread:$0]  %s141_s1, 64, %s260_s2, [#allocation4]  }
  0x3b   :  { %219 = dma.done.wait [#allocation4], 64  }
  0x3c   :  { %220 = vsyncadd [#allocation4], 4294967232 }
  0x3d   :  { %147 = vsyncpa [#allocation3], 1 }
  0x3e   :  { %148 = vsyncpa [#allocation6], 1 }
  0x3f   :  { %149 = vsyncpa [#allocation4], 1 }

</bundles_post_ra>
